<compile_context>
chip_gen: v5e
topology: v5e:2x2
jax: 0.10.0
libtpu: 0.0.40
codegen_flags: <defaults>
</compile_context>

<pallas_src>
import functools

import jax
import jax.numpy as jnp
from jax.experimental import pallas as pl
from jax.experimental.pallas import tpu as pltpu

H1 = 256          # hidden width of block 1
H2 = 64           # hidden width of blocks 2/3 (PyTorch)
H2P = 128         # lane-dense padded hidden width used inside the kernel
OUT = 19          # number of classes
OUT_PAD = 32      # padded output width (block last dim == full array dim)
LANE = 128
MAX_TK = 1024     # max contraction tile for layer 1 (K-tiling for huge D)
BN_EPS = 1e-5


def _round_up(x, m):
    return (x + m - 1) // m * m


def _cdiv(a, b):
    return (a + b - 1) // b


def _vmem_capacity_bytes():
    try:
        info = pltpu.get_tpu_info()
        return int(getattr(info, "vmem_capacity_bytes", 64 * 2**20))
    except Exception:
        return 64 * 2**20   # conservative fallback: v7x per-TC physical VMEM


def _mlp_kernel(x_ref, a1_ref, c1_ref, a2_ref, c2_ref, a3_ref, c3_ref,
                w4_ref, b4_ref, o_ref, acc_ref):
    k = pl.program_id(1)

    # Layer 1 (BN0 + Linear + BN1 folded): K-tiled accumulation in f32.
    @pl.when(k == 0)
    def _():
        acc_ref[...] = jnp.zeros_like(acc_ref)

    acc_ref[...] += jnp.dot(x_ref[...], a1_ref[...],
                            preferred_element_type=jnp.float32)

    @pl.when(k == pl.num_programs(1) - 1)
    def _():
        # ReLU (Dropout = identity in eval mode).
        h = jnp.maximum(acc_ref[...] + c1_ref[...], 0.0)
        # Layer 2 (Linear + BN2 folded) + ReLU.
        h = jnp.dot(h.astype(a2_ref.dtype), a2_ref[...],
                    preferred_element_type=jnp.float32)
        h = jnp.maximum(h + c2_ref[...], 0.0)
        # Layer 3 (Linear + BN3 folded) + ReLU.
        h = jnp.dot(h.astype(a3_ref.dtype), a3_ref[...],
                    preferred_element_type=jnp.float32)
        h = jnp.maximum(h + c3_ref[...], 0.0)
        # Output head (Linear 64 -> 19, zero-padded to 32 lanes).
        o = jnp.dot(h.astype(w4_ref.dtype), w4_ref[...],
                    preferred_element_type=jnp.float32)
        o_ref[...] = (o + b4_ref[...]).astype(o_ref.dtype)


def _fold_bn(gamma, beta, mean, var, eps=BN_EPS):
    s = gamma * jax.lax.rsqrt(var + eps)
    return s, beta - mean * s


@functools.partial(jax.jit, static_argnames=("block_b", "use_bf16", "single_buffer"))
def relation_classifier_forward(x, params, *, block_b=1024, use_bf16=True,
                                single_buffer=True):
    """x: [B, input_dim] float32. Returns [B, 19] float32 logits (eval mode)."""
    B, D = x.shape
    p = params

    # ---- fold eval-mode BatchNorms into the linear layers (f32) ----
    s0, t0 = _fold_bn(p["bn0_g"], p["bn0_b"], p["bn0_m"], p["bn0_v"])
    s1, t1 = _fold_bn(p["bn1_g"], p["bn1_b"], p["bn1_m"], p["bn1_v"])
    s2, t2 = _fold_bn(p["bn2_g"], p["bn2_b"], p["bn2_m"], p["bn2_v"])
    s3, t3 = _fold_bn(p["bn3_g"], p["bn3_b"], p["bn3_m"], p["bn3_v"])

    a1 = (s0[:, None] * p["w1"]) * s1[None, :]          # [D, 256]
    c1 = ((t0 @ p["w1"]) * s1 + t1)[None, :]            # [1, 256]
    a2 = p["w2"] * s2[None, :]                          # [256, 64]
    c2 = t2[None, :]                                    # [1, 64]
    a3 = p["w3"] * s3[None, :]                          # [64, 64]
    c3 = t3[None, :]                                    # [1, 64]
    w4, b4 = p["w4"], p["b4"]                           # [64, 19], [1, 19]

    # ---- lane-dense feature padding + layer-1 contraction tiling ----
    d_pad = _round_up(D, LANE)
    nk = _cdiv(d_pad, MAX_TK)
    tk = _round_up(_cdiv(d_pad, nk), LANE)
    d_pad = nk * tk

    mx_dtype = jnp.bfloat16 if use_bf16 else jnp.float32
    itemsize = 2 if use_bf16 else 4
    sub = 16 if use_bf16 else 8     # bf16 x tile packs (16,128) per vreg

    # ---- VMEM budget from the actual chip (v7x: 64 MiB, v5e/v6e: 128 MiB) ----
    usable = int(0.75 * _vmem_capacity_bytes())
    per_row = (2 * tk * itemsize        # double-buffered x tile
               + H1 * 4                 # layer-1 f32 accumulator scratch
               + (H1 + 2 * H2P) * 4     # live f32 intermediates h1..h3
               + 2 * OUT_PAD * 4)       # double-buffered output tile
    weight_bytes = ((2 * tk * H1                            # a1 tiles (dbl-buf)
                     + 2 * (H1 * H2P + H2P * H2P + H2P * OUT_PAD)) * itemsize
                    + 2 * (H1 + 2 * H2P + OUT_PAD) * 4)     # biases (f32)
    row_budget = max(sub * per_row, usable - weight_bytes - (2 << 20))

    # ---- batch tile: large (amortize ~0.35us/step), >=2 grid steps so both
    #      v7x TensorCores get work, shrunk to fit the VMEM budget ----
    b_ceil = _round_up(B, sub)
    bb = min(_round_up(block_b, sub), b_ceil)
    if b_ceil > sub:
        bb = min(bb, max(sub, _round_up(_cdiv(b_ceil, 2), sub)))
    while bb > sub and bb * per_row > row_budget:
        bb = max(sub, _round_up(bb // 2, sub))
    block_b = bb
    b_pad = _round_up(B, block_b)

    # ---- pad & cast operands (zero pads are exact through ReLU/matmul) ----
    x_p = jnp.pad(x, ((0, b_pad - B), (0, d_pad - D))).astype(mx_dtype)
    a1_p = jnp.pad(a1, ((0, d_pad - D), (0, 0))).astype(mx_dtype)
    a2_p = jnp.pad(a2, ((0, 0), (0, H2P - H2))).astype(mx_dtype)
    c2_p = jnp.pad(c2, ((0, 0), (0, H2P - H2)))
    a3_p = jnp.pad(a3, ((0, H2P - H2), (0, H2P - H2))).astype(mx_dtype)
    c3_p = jnp.pad(c3, ((0, 0), (0, H2P - H2)))
    w4_p = jnp.pad(w4, ((0, H2P - H2), (0, OUT_PAD - OUT))).astype(mx_dtype)
    b4_p = jnp.pad(b4, ((0, 0), (0, OUT_PAD - OUT)))     # stays f32

    grid = (b_pad // block_b, nk)

    vmem_limit = int(min(usable,
                         max(32 * 2**20,
                             block_b * per_row + weight_bytes + (4 << 20))))

    flops = 2 * b_pad * (d_pad * H1 + H1 * H2P + H2P * H2P + H2P * OUT_PAD)
    bytes_accessed = (b_pad * d_pad * itemsize            # x stream (dominant)
                      + b_pad * OUT_PAD * 4               # output stream
                      + (d_pad * H1 + H1 * H2P + H2P * H2P + H2P * OUT_PAD) * itemsize
                      + (H1 + 2 * H2P + OUT_PAD) * 4)

    # Grid-invariant operands: constant index_map -> fetched once; request a
    # single buffer so they don't consume 2x VMEM (falls back on older jax).
    def full_spec(arr):
        idx = lambda i, k: (0, 0)
        if single_buffer and hasattr(pl, "Buffered"):
            try:
                return pl.BlockSpec(arr.shape, idx, pipeline_mode=pl.Buffered(1))
            except (TypeError, ValueError):
                pass
        return pl.BlockSpec(arr.shape, idx)

    out = pl.pallas_call(
        _mlp_kernel,
        out_shape=jax.ShapeDtypeStruct((b_pad, OUT_PAD), jnp.float32),
        grid=grid,
        in_specs=[
            pl.BlockSpec((block_b, tk), lambda i, k: (i, k)),   # x: batch x K tiles
            pl.BlockSpec((tk, H1), lambda i, k: (k, 0)),        # a1: K tiles
            full_spec(c1),
            full_spec(a2_p), full_spec(c2_p),
            full_spec(a3_p), full_spec(c3_p),
            full_spec(w4_p), full_spec(b4_p),
        ],
        out_specs=pl.BlockSpec((block_b, OUT_PAD), lambda i, k: (i, 0)),
        scratch_shapes=[pltpu.VMEM((block_b, H1), jnp.float32)],
        compiler_params=pltpu.CompilerParams(
            dimension_semantics=("parallel", "arbitrary"),
            vmem_limit_bytes=vmem_limit,
        ),
        cost_estimate=pl.CostEstimate(
            flops=flops, transcendentals=0, bytes_accessed=bytes_accessed),
    )(x_p, a1_p, c1, a2_p, c2_p, a3_p, c3_p, w4_p, b4_p)

    return out[:B, :OUT]


def init_params(key, input_dim):
    """PyTorch-style init; weights stored as [in_features, out_features].

    BatchNorm running stats are randomized (not the fresh 0/1 defaults) so the
    test actually exercises the BN folding.
    """
    ks = jax.random.split(key, 21)

    def linear_w(k, fan_in, fan_out):
        bound = 1.0 / jnp.sqrt(fan_in)
        return jax.random.uniform(k, (fan_in, fan_out), jnp.float32, -bound, bound)

    def bn(kg, kb, km, kv, dim):
        return (jax.random.uniform(kg, (dim,), jnp.float32, 0.5, 1.5),
                0.1 * jax.random.normal(kb, (dim,), jnp.float32),
                0.2 * jax.random.normal(km, (dim,), jnp.float32),
                jax.random.uniform(kv, (dim,), jnp.float32, 0.5, 1.5))

    p = {}
    p["bn0_g"], p["bn0_b"], p["bn0_m"], p["bn0_v"] = bn(*ks[0:4], input_dim)
    p["w1"] = linear_w(ks[4], input_dim, H1)
    p["bn1_g"], p["bn1_b"], p["bn1_m"], p["bn1_v"] = bn(*ks[5:9], H1)
    p["w2"] = linear_w(ks[9], H1, H2)
    p["bn2_g"], p["bn2_b"], p["bn2_m"], p["bn2_v"] = bn(*ks[10:14], H2)
    p["w3"] = linear_w(ks[14], H2, H2)
    p["bn3_g"], p["bn3_b"], p["bn3_m"], p["bn3_v"] = bn(*ks[15:19], H2)
    p["w4"] = linear_w(ks[19], H2, OUT)
    bound = 1.0 / jnp.sqrt(H2)
    p["b4"] = jax.random.uniform(ks[20], (1, OUT), jnp.float32, -bound, bound)
    return p


def _reference(x, p, eps=BN_EPS):
    """Unfused eval-mode forward of RelationClassifierPro (Dropout = identity)."""
    def bn(v, g, b, m, var):
        return (v - m) / jnp.sqrt(var + eps) * g + b

    h = bn(x, p["bn0_g"], p["bn0_b"], p["bn0_m"], p["bn0_v"])
    h = jnp.maximum(bn(h @ p["w1"], p["bn1_g"], p["bn1_b"], p["bn1_m"], p["bn1_v"]), 0.0)
    h = jnp.maximum(bn(h @ p["w2"], p["bn2_g"], p["bn2_b"], p["bn2_m"], p["bn2_v"]), 0.0)
    h = jnp.maximum(bn(h @ p["w3"], p["bn3_g"], p["bn3_b"], p["bn3_m"], p["bn3_v"]), 0.0)
    return h @ p["w4"] + p["b4"]


if __name__ == "__main__":
    key = jax.random.PRNGKey(0)
    k_x, k_p = jax.random.split(key)

    # Small, deliberately "awkward" shapes (batch not a multiple of 8/16,
    # feature dim not a multiple of 128) to exercise the padding paths.
    input_dim = 40
    batch = 6

    x = jax.random.normal(k_x, (batch, input_dim), jnp.float32)
    params = init_params(k_p, input_dim)
    ref = _reference(x, params)

    def run(**kw):
        return jax.block_until_ready(relation_classifier_forward(x, params, **kw))

    # Default path: bf16 matmul operands + single-buffered weights.  If this
    # jax build rejects pl.Buffered(1), retry with default double buffering.
    try:
        out = run()
        sb = True
    except Exception:
        sb = False
        out = run(single_buffer=False)
    assert out.shape == (batch, OUT)
    assert jnp.allclose(out, ref, atol=2e-1, rtol=1e-1), \
        float(jnp.max(jnp.abs(out - ref)))

    # f32 operand path: tight correctness check of the fused BN-folded kernel.
    out_f32 = run(use_bf16=False, single_buffer=sb)
    assert out_f32.shape == (batch, OUT)
    assert jnp.allclose(out_f32, ref, atol=2e-3, rtol=2e-3), \
        float(jnp.max(jnp.abs(out_f32 - ref)))

    print("KERNEL_OK")
</pallas_src>

<mosaic_0001>
module attributes {stable_mosaic.version = 11 : i64} {
  func.func @_mlp_kernel(%arg0: i32, %arg1: i32, %arg2: memref<16x128xbf16, #tpu.memory_space<vmem>>, %arg3: memref<128x256xbf16, #tpu.memory_space<vmem>>, %arg4: memref<1x256xf32, #tpu.memory_space<vmem>>, %arg5: memref<256x128xbf16, #tpu.memory_space<vmem>>, %arg6: memref<1x128xf32, #tpu.memory_space<vmem>>, %arg7: memref<128x128xbf16, #tpu.memory_space<vmem>>, %arg8: memref<1x128xf32, #tpu.memory_space<vmem>>, %arg9: memref<128x32xbf16, #tpu.memory_space<vmem>>, %arg10: memref<1x32xf32, #tpu.memory_space<vmem>>, %arg11: memref<16x32xf32, #tpu.memory_space<vmem>>, %arg12: memref<16x256xf32, #tpu.memory_space<vmem>>) attributes {dimension_semantics = [#tpu.dimension_semantics<parallel>, #tpu.dimension_semantics<arbitrary>], iteration_bounds = array<i64: 1, 1>, scalar_prefetch = 0 : i64, scratch_operands = 1 : i64, tpu.core_type = #tpu.core_type<tc>, window_params = [{transform_indices = @transform_0, window_bounds = array<i64: 16, 128>}, {transform_indices = @transform_1, window_bounds = array<i64: 128, 256>}, {pipeline_mode = #tpu.pipeline_mode<synchronous>, transform_indices = @transform_2, window_bounds = array<i64: 1, 256>}, {pipeline_mode = #tpu.pipeline_mode<synchronous>, transform_indices = @transform_3, window_bounds = array<i64: 256, 128>}, {pipeline_mode = #tpu.pipeline_mode<synchronous>, transform_indices = @transform_4, window_bounds = array<i64: 1, 128>}, {pipeline_mode = #tpu.pipeline_mode<synchronous>, transform_indices = @transform_5, window_bounds = array<i64: 128, 128>}, {pipeline_mode = #tpu.pipeline_mode<synchronous>, transform_indices = @transform_6, window_bounds = array<i64: 1, 128>}, {pipeline_mode = #tpu.pipeline_mode<synchronous>, transform_indices = @transform_7, window_bounds = array<i64: 128, 32>}, {pipeline_mode = #tpu.pipeline_mode<synchronous>, transform_indices = @transform_8, window_bounds = array<i64: 1, 32>}, {transform_indices = @transform_9, window_bounds = array<i64: 16, 32>}]} {
    %c0_i32 = arith.constant 0 : i32
    %0 = arith.cmpi eq, %arg1, %c0_i32 : i32
    %1 = arith.extui %0 : i1 to i32
    %c0_i32_0 = arith.constant 0 : i32
    %2 = arith.cmpi ne, %1, %c0_i32_0 : i32
    scf.if %2 {
      %cst_10 = arith.constant 0.000000e+00 : f32
      %12 = vector.broadcast %cst_10 : f32 to vector<16x256xf32>
      %c0_11 = arith.constant 0 : index
      %c0_12 = arith.constant 0 : index
      %13 = vector.load %arg12[%c0_11, %c0_12] : memref<16x256xf32, #tpu.memory_space<vmem>>, vector<16x256xf32>
      tpu.vector_store %arg12[%c0_11, %c0_12], %12 {strides = array<i32>} : memref<16x256xf32, #tpu.memory_space<vmem>>, vector<16x256xf32>,
    } else {
    }
    %c0 = arith.constant 0 : index
    %c0_1 = arith.constant 0 : index
    %3 = vector.load %arg12[%c0, %c0_1] : memref<16x256xf32, #tpu.memory_space<vmem>>, vector<16x256xf32>
    %c0_2 = arith.constant 0 : index
    %c0_3 = arith.constant 0 : index
    %4 = vector.load %arg2[%c0_2, %c0_3] : memref<16x128xbf16, #tpu.memory_space<vmem>>, vector<16x128xbf16>
    %c0_4 = arith.constant 0 : index
    %c0_5 = arith.constant 0 : index
    %5 = vector.load %arg3[%c0_4, %c0_5] : memref<128x256xbf16, #tpu.memory_space<vmem>>, vector<128x256xbf16>
    %cst = arith.constant dense<0.000000e+00> : vector<16x256xf32>
    %6 = tpu.matmul %4, %5, %cst {dimension_numbers = #tpu.dot_dimension_numbers<[1], [0], [0], [1], [0, 0, 1, 1], [], []>} : vector<16x128xbf16>, vector<128x256xbf16>, vector<16x256xf32> -> vector<16x256xf32>
    %7 = arith.addf %3, %6 : vector<16x256xf32>
    %c0_6 = arith.constant 0 : index
    %c0_7 = arith.constant 0 : index
    %8 = vector.load %arg12[%c0_6, %c0_7] : memref<16x256xf32, #tpu.memory_space<vmem>>, vector<16x256xf32>
    tpu.vector_store %arg12[%c0_6, %c0_7], %7 {strides = array<i32>} : memref<16x256xf32, #tpu.memory_space<vmem>>, vector<16x256xf32>,
    %c0_i32_8 = arith.constant 0 : i32
    %9 = arith.cmpi eq, %arg1, %c0_i32_8 : i32
    %10 = arith.extui %9 : i1 to i32
    %c0_i32_9 = arith.constant 0 : i32
    %11 = arith.cmpi ne, %10, %c0_i32_9 : i32
    scf.if %11 {
      %c0_10 = arith.constant 0 : index
      %c0_11 = arith.constant 0 : index
      %12 = vector.load %arg12[%c0_10, %c0_11] : memref<16x256xf32, #tpu.memory_space<vmem>>, vector<16x256xf32>
      %c0_12 = arith.constant 0 : index
      %c0_13 = arith.constant 0 : index
      %13 = vector.load %arg4[%c0_12, %c0_13] : memref<1x256xf32, #tpu.memory_space<vmem>>, vector<1x256xf32>
      %14 = vector.broadcast %13 : vector<1x256xf32> to vector<16x256xf32>
      %15 = arith.addf %12, %14 : vector<16x256xf32>
      %cst_14 = arith.constant 0.000000e+00 : f32
      %16 = vector.broadcast %cst_14 : f32 to vector<16x256xf32>
      %17 = arith.maximumf %15, %16 : vector<16x256xf32>
      %18 = arith.truncf %17 : vector<16x256xf32> to vector<16x256xbf16>
      %c0_15 = arith.constant 0 : index
      %c0_16 = arith.constant 0 : index
      %19 = vector.load %arg5[%c0_15, %c0_16] : memref<256x128xbf16, #tpu.memory_space<vmem>>, vector<256x128xbf16>
      %cst_17 = arith.constant dense<0.000000e+00> : vector<16x128xf32>
      %20 = tpu.matmul %18, %19, %cst_17 {dimension_numbers = #tpu.dot_dimension_numbers<[1], [0], [0], [1], [0, 0, 1, 1], [], []>} : vector<16x256xbf16>, vector<256x128xbf16>, vector<16x128xf32> -> vector<16x128xf32>
      %c0_18 = arith.constant 0 : index
      %c0_19 = arith.constant 0 : index
      %21 = vector.load %arg6[%c0_18, %c0_19] : memref<1x128xf32, #tpu.memory_space<vmem>>, vector<1x128xf32>
      %22 = vector.broadcast %21 : vector<1x128xf32> to vector<16x128xf32>
      %23 = arith.addf %20, %22 : vector<16x128xf32>
      %cst_20 = arith.constant 0.000000e+00 : f32
      %24 = vector.broadcast %cst_20 : f32 to vector<16x128xf32>
      %25 = arith.maximumf %23, %24 : vector<16x128xf32>
      %26 = arith.truncf %25 : vector<16x128xf32> to vector<16x128xbf16>
      %c0_21 = arith.constant 0 : index
      %c0_22 = arith.constant 0 : index
      %27 = vector.load %arg7[%c0_21, %c0_22] : memref<128x128xbf16, #tpu.memory_space<vmem>>, vector<128x128xbf16>
      %cst_23 = arith.constant dense<0.000000e+00> : vector<16x128xf32>
      %28 = tpu.matmul %26, %27, %cst_23 {dimension_numbers = #tpu.dot_dimension_numbers<[1], [0], [0], [1], [0, 0, 1, 1], [], []>} : vector<16x128xbf16>, vector<128x128xbf16>, vector<16x128xf32> -> vector<16x128xf32>
      %c0_24 = arith.constant 0 : index
      %c0_25 = arith.constant 0 : index
      %29 = vector.load %arg8[%c0_24, %c0_25] : memref<1x128xf32, #tpu.memory_space<vmem>>, vector<1x128xf32>
      %30 = vector.broadcast %29 : vector<1x128xf32> to vector<16x128xf32>
      %31 = arith.addf %28, %30 : vector<16x128xf32>
      %cst_26 = arith.constant 0.000000e+00 : f32
      %32 = vector.broadcast %cst_26 : f32 to vector<16x128xf32>
      %33 = arith.maximumf %31, %32 : vector<16x128xf32>
      %34 = arith.truncf %33 : vector<16x128xf32> to vector<16x128xbf16>
      %c0_27 = arith.constant 0 : index
      %c0_28 = arith.constant 0 : index
      %35 = vector.load %arg9[%c0_27, %c0_28] : memref<128x32xbf16, #tpu.memory_space<vmem>>, vector<128x32xbf16>
      %cst_29 = arith.constant dense<0.000000e+00> : vector<16x32xf32>
      %36 = tpu.matmul %34, %35, %cst_29 {dimension_numbers = #tpu.dot_dimension_numbers<[1], [0], [0], [1], [0, 0, 1, 1], [], []>} : vector<16x128xbf16>, vector<128x32xbf16>, vector<16x32xf32> -> vector<16x32xf32>
      %c0_30 = arith.constant 0 : index
      %c0_31 = arith.constant 0 : index
      %37 = vector.load %arg10[%c0_30, %c0_31] : memref<1x32xf32, #tpu.memory_space<vmem>>, vector<1x32xf32>
      %38 = vector.broadcast %37 : vector<1x32xf32> to vector<16x32xf32>
      %39 = arith.addf %36, %38 : vector<16x32xf32>
      %c0_32 = arith.constant 0 : index
      %c0_33 = arith.constant 0 : index
      %40 = vector.load %arg11[%c0_32, %c0_33] : memref<16x32xf32, #tpu.memory_space<vmem>>, vector<16x32xf32>
      tpu.vector_store %arg11[%c0_32, %c0_33], %39 {strides = array<i32>} : memref<16x32xf32, #tpu.memory_space<vmem>>, vector<16x32xf32>,
    } else {
    }
    return
  }
  func.func @transform_0(%arg0: i32, %arg1: i32) -> (i32, i32) {
    %c0_i32 = arith.constant 0 : i32
    return %arg0, %arg1 : i32, i32
  }
  func.func @transform_1(%arg0: i32, %arg1: i32) -> (i32, i32) {
    %c0_i32 = arith.constant 0 : i32
    %c0_i32_0 = arith.constant 0 : i32
    return %arg1, %c0_i32 : i32, i32
  }
  func.func @transform_2(%arg0: i32, %arg1: i32) -> (i32, i32) {
    %c0_i32 = arith.constant 0 : i32
    %c0_i32_0 = arith.constant 0 : i32
    %c0_i32_1 = arith.constant 0 : i32
    return %c0_i32, %c0_i32_0 : i32, i32
  }
  func.func @transform_3(%arg0: i32, %arg1: i32) -> (i32, i32) {
    %c0_i32 = arith.constant 0 : i32
    %c0_i32_0 = arith.constant 0 : i32
    %c0_i32_1 = arith.constant 0 : i32
    return %c0_i32, %c0_i32_0 : i32, i32
  }
  func.func @transform_4(%arg0: i32, %arg1: i32) -> (i32, i32) {
    %c0_i32 = arith.constant 0 : i32
    %c0_i32_0 = arith.constant 0 : i32
    %c0_i32_1 = arith.constant 0 : i32
    return %c0_i32, %c0_i32_0 : i32, i32
  }
  func.func @transform_5(%arg0: i32, %arg1: i32) -> (i32, i32) {
    %c0_i32 = arith.constant 0 : i32
    %c0_i32_0 = arith.constant 0 : i32
    %c0_i32_1 = arith.constant 0 : i32
    return %c0_i32, %c0_i32_0 : i32, i32
  }
  func.func @transform_6(%arg0: i32, %arg1: i32) -> (i32, i32) {
    %c0_i32 = arith.constant 0 : i32
    %c0_i32_0 = arith.constant 0 : i32
    %c0_i32_1 = arith.constant 0 : i32
    return %c0_i32, %c0_i32_0 : i32, i32
  }
  func.func @transform_7(%arg0: i32, %arg1: i32) -> (i32, i32) {
    %c0_i32 = arith.constant 0 : i32
    %c0_i32_0 = arith.constant 0 : i32
    %c0_i32_1 = arith.constant 0 : i32
    return %c0_i32, %c0_i32_0 : i32, i32
  }
  func.func @transform_8(%arg0: i32, %arg1: i32) -> (i32, i32) {
    %c0_i32 = arith.constant 0 : i32
    %c0_i32_0 = arith.constant 0 : i32
    %c0_i32_1 = arith.constant 0 : i32
    return %c0_i32, %c0_i32_0 : i32, i32
  }
  func.func @transform_9(%arg0: i32, %arg1: i32) -> (i32, i32) {
    %c0_i32 = arith.constant 0 : i32
    %c0_i32_0 = arith.constant 0 : i32
    return %arg0, %c0_i32 : i32, i32
  }
}

module attributes {stable_mosaic.version = 11 : i64} {
  func.func @_mlp_kernel(%arg0: i32, %arg1: i32, %arg2: memref<16x128xbf16, #tpu.memory_space<vmem>>, %arg3: memref<128x256xbf16, #tpu.memory_space<vmem>>, %arg4: memref<1x256xf32, #tpu.memory_space<vmem>>, %arg5: memref<256x128xbf16, #tpu.memory_space<vmem>>, %arg6: memref<1x128xf32, #tpu.memory_space<vmem>>, %arg7: memref<128x128xbf16, #tpu.memory_space<vmem>>, %arg8: memref<1x128xf32, #tpu.memory_space<vmem>>, %arg9: memref<128x32xbf16, #tpu.memory_space<vmem>>, %arg10: memref<1x32xf32, #tpu.memory_space<vmem>>, %arg11: memref<16x32xf32, #tpu.memory_space<vmem>>, %arg12: memref<16x256xf32, #tpu.memory_space<vmem>>) attributes {dimension_semantics = [#tpu.dimension_semantics<parallel>, #tpu.dimension_semantics<arbitrary>], iteration_bounds = array<i64: 1, 1>, scalar_prefetch = 0 : i64, scratch_operands = 1 : i64, tpu.core_type = #tpu.core_type<tc>, window_params = [{transform_indices = @transform_0, window_bounds = array<i64: 16, 128>}, {transform_indices = @transform_1, window_bounds = array<i64: 128, 256>}, {pipeline_mode = #tpu.pipeline_mode<synchronous>, transform_indices = @transform_2, window_bounds = array<i64: 1, 256>}, {pipeline_mode = #tpu.pipeline_mode<synchronous>, transform_indices = @transform_3, window_bounds = array<i64: 256, 128>}, {pipeline_mode = #tpu.pipeline_mode<synchronous>, transform_indices = @transform_4, window_bounds = array<i64: 1, 128>}, {pipeline_mode = #tpu.pipeline_mode<synchronous>, transform_indices = @transform_5, window_bounds = array<i64: 128, 128>}, {pipeline_mode = #tpu.pipeline_mode<synchronous>, transform_indices = @transform_6, window_bounds = array<i64: 1, 128>}, {pipeline_mode = #tpu.pipeline_mode<synchronous>, transform_indices = @transform_7, window_bounds = array<i64: 128, 32>}, {pipeline_mode = #tpu.pipeline_mode<synchronous>, transform_indices = @transform_8, window_bounds = array<i64: 1, 32>}, {transform_indices = @transform_9, window_bounds = array<i64: 16, 32>}]} {
    %c0_i32 = arith.constant 0 : i32
    %0 = arith.cmpi eq, %arg1, %c0_i32 : i32
    %1 = arith.extui %0 : i1 to i32
    %c0_i32_0 = arith.constant 0 : i32
    %2 = arith.cmpi ne, %1, %c0_i32_0 : i32
    scf.if %2 {
      %cst_10 = arith.constant 0.000000e+00 : f32
      %12 = vector.broadcast %cst_10 : f32 to vector<16x256xf32>
      %c0_11 = arith.constant 0 : index
      %c0_12 = arith.constant 0 : index
      %13 = vector.load %arg12[%c0_11, %c0_12] : memref<16x256xf32, #tpu.memory_space<vmem>>, vector<16x256xf32>
      tpu.vector_store %arg12[%c0_11, %c0_12], %12 {strides = array<i32>} : memref<16x256xf32, #tpu.memory_space<vmem>>, vector<16x256xf32>,
    } else {
    }
    %c0 = arith.constant 0 : index
    %c0_1 = arith.constant 0 : index
    %3 = vector.load %arg12[%c0, %c0_1] : memref<16x256xf32, #tpu.memory_space<vmem>>, vector<16x256xf32>
    %c0_2 = arith.constant 0 : index
    %c0_3 = arith.constant 0 : index
    %4 = vector.load %arg2[%c0_2, %c0_3] : memref<16x128xbf16, #tpu.memory_space<vmem>>, vector<16x128xbf16>
    %c0_4 = arith.constant 0 : index
    %c0_5 = arith.constant 0 : index
    %5 = vector.load %arg3[%c0_4, %c0_5] : memref<128x256xbf16, #tpu.memory_space<vmem>>, vector<128x256xbf16>
    %cst = arith.constant dense<0.000000e+00> : vector<16x256xf32>
    %6 = tpu.matmul %4, %5, %cst {dimension_numbers = #tpu.dot_dimension_numbers<[1], [0], [0], [1], [0, 0, 1, 1], [], []>} : vector<16x128xbf16>, vector<128x256xbf16>, vector<16x256xf32> -> vector<16x256xf32>
    %7 = arith.addf %3, %6 : vector<16x256xf32>
    %c0_6 = arith.constant 0 : index
    %c0_7 = arith.constant 0 : index
    %8 = vector.load %arg12[%c0_6, %c0_7] : memref<16x256xf32, #tpu.memory_space<vmem>>, vector<16x256xf32>
    tpu.vector_store %arg12[%c0_6, %c0_7], %7 {strides = array<i32>} : memref<16x256xf32, #tpu.memory_space<vmem>>, vector<16x256xf32>,
    %c0_i32_8 = arith.constant 0 : i32
    %9 = arith.cmpi eq, %arg1, %c0_i32_8 : i32
    %10 = arith.extui %9 : i1 to i32
    %c0_i32_9 = arith.constant 0 : i32
    %11 = arith.cmpi ne, %10, %c0_i32_9 : i32
    scf.if %11 {
      %c0_10 = arith.constant 0 : index
      %c0_11 = arith.constant 0 : index
      %12 = vector.load %arg12[%c0_10, %c0_11] : memref<16x256xf32, #tpu.memory_space<vmem>>, vector<16x256xf32>
      %c0_12 = arith.constant 0 : index
      %c0_13 = arith.constant 0 : index
      %13 = vector.load %arg4[%c0_12, %c0_13] : memref<1x256xf32, #tpu.memory_space<vmem>>, vector<1x256xf32>
      %14 = vector.broadcast %13 : vector<1x256xf32> to vector<16x256xf32>
      %15 = arith.addf %12, %14 : vector<16x256xf32>
      %cst_14 = arith.constant 0.000000e+00 : f32
      %16 = vector.broadcast %cst_14 : f32 to vector<16x256xf32>
      %17 = arith.maximumf %15, %16 : vector<16x256xf32>
      %18 = arith.truncf %17 : vector<16x256xf32> to vector<16x256xbf16>
      %c0_15 = arith.constant 0 : index
      %c0_16 = arith.constant 0 : index
      %19 = vector.load %arg5[%c0_15, %c0_16] : memref<256x128xbf16, #tpu.memory_space<vmem>>, vector<256x128xbf16>
      %cst_17 = arith.constant dense<0.000000e+00> : vector<16x128xf32>
      %20 = tpu.matmul %18, %19, %cst_17 {dimension_numbers = #tpu.dot_dimension_numbers<[1], [0], [0], [1], [0, 0, 1, 1], [], []>} : vector<16x256xbf16>, vector<256x128xbf16>, vector<16x128xf32> -> vector<16x128xf32>
      %c0_18 = arith.constant 0 : index
      %c0_19 = arith.constant 0 : index
      %21 = vector.load %arg6[%c0_18, %c0_19] : memref<1x128xf32, #tpu.memory_space<vmem>>, vector<1x128xf32>
      %22 = vector.broadcast %21 : vector<1x128xf32> to vector<16x128xf32>
      %23 = arith.addf %20, %22 : vector<16x128xf32>
      %cst_20 = arith.constant 0.000000e+00 : f32
      %24 = vector.broadcast %cst_20 : f32 to vector<16x128xf32>
      %25 = arith.maximumf %23, %24 : vector<16x128xf32>
      %26 = arith.truncf %25 : vector<16x128xf32> to vector<16x128xbf16>
      %c0_21 = arith.constant 0 : index
      %c0_22 = arith.constant 0 : index
      %27 = vector.load %arg7[%c0_21, %c0_22] : memref<128x128xbf16, #tpu.memory_space<vmem>>, vector<128x128xbf16>
      %cst_23 = arith.constant dense<0.000000e+00> : vector<16x128xf32>
      %28 = tpu.matmul %26, %27, %cst_23 {dimension_numbers = #tpu.dot_dimension_numbers<[1], [0], [0], [1], [0, 0, 1, 1], [], []>} : vector<16x128xbf16>, vector<128x128xbf16>, vector<16x128xf32> -> vector<16x128xf32>
      %c0_24 = arith.constant 0 : index
      %c0_25 = arith.constant 0 : index
      %29 = vector.load %arg8[%c0_24, %c0_25] : memref<1x128xf32, #tpu.memory_space<vmem>>, vector<1x128xf32>
      %30 = vector.broadcast %29 : vector<1x128xf32> to vector<16x128xf32>
      %31 = arith.addf %28, %30 : vector<16x128xf32>
      %cst_26 = arith.constant 0.000000e+00 : f32
      %32 = vector.broadcast %cst_26 : f32 to vector<16x128xf32>
      %33 = arith.maximumf %31, %32 : vector<16x128xf32>
      %34 = arith.truncf %33 : vector<16x128xf32> to vector<16x128xbf16>
      %c0_27 = arith.constant 0 : index
      %c0_28 = arith.constant 0 : index
      %35 = vector.load %arg9[%c0_27, %c0_28] : memref<128x32xbf16, #tpu.memory_space<vmem>>, vector<128x32xbf16>
      %cst_29 = arith.constant dense<0.000000e+00> : vector<16x32xf32>
      %36 = tpu.matmul %34, %35, %cst_29 {dimension_numbers = #tpu.dot_dimension_numbers<[1], [0], [0], [1], [0, 0, 1, 1], [], []>} : vector<16x128xbf16>, vector<128x32xbf16>, vector<16x32xf32> -> vector<16x32xf32>
      %c0_30 = arith.constant 0 : index
      %c0_31 = arith.constant 0 : index
      %37 = vector.load %arg10[%c0_30, %c0_31] : memref<1x32xf32, #tpu.memory_space<vmem>>, vector<1x32xf32>
      %38 = vector.broadcast %37 : vector<1x32xf32> to vector<16x32xf32>
      %39 = arith.addf %36, %38 : vector<16x32xf32>
      %c0_32 = arith.constant 0 : index
      %c0_33 = arith.constant 0 : index
      %40 = vector.load %arg11[%c0_32, %c0_33] : memref<16x32xf32, #tpu.memory_space<vmem>>, vector<16x32xf32>
      tpu.vector_store %arg11[%c0_32, %c0_33], %39 {strides = array<i32>} : memref<16x32xf32, #tpu.memory_space<vmem>>, vector<16x32xf32>,
    } else {
    }
    return
  }
  func.func @transform_0(%arg0: i32, %arg1: i32) -> (i32, i32) {
    %c0_i32 = arith.constant 0 : i32
    return %arg0, %arg1 : i32, i32
  }
  func.func @transform_1(%arg0: i32, %arg1: i32) -> (i32, i32) {
    %c0_i32 = arith.constant 0 : i32
    %c0_i32_0 = arith.constant 0 : i32
    return %arg1, %c0_i32 : i32, i32
  }
  func.func @transform_2(%arg0: i32, %arg1: i32) -> (i32, i32) {
    %c0_i32 = arith.constant 0 : i32
    %c0_i32_0 = arith.constant 0 : i32
    %c0_i32_1 = arith.constant 0 : i32
    return %c0_i32, %c0_i32_0 : i32, i32
  }
  func.func @transform_3(%arg0: i32, %arg1: i32) -> (i32, i32) {
    %c0_i32 = arith.constant 0 : i32
    %c0_i32_0 = arith.constant 0 : i32
    %c0_i32_1 = arith.constant 0 : i32
    return %c0_i32, %c0_i32_0 : i32, i32
  }
  func.func @transform_4(%arg0: i32, %arg1: i32) -> (i32, i32) {
    %c0_i32 = arith.constant 0 : i32
    %c0_i32_0 = arith.constant 0 : i32
    %c0_i32_1 = arith.constant 0 : i32
    return %c0_i32, %c0_i32_0 : i32, i32
  }
  func.func @transform_5(%arg0: i32, %arg1: i32) -> (i32, i32) {
    %c0_i32 = arith.constant 0 : i32
    %c0_i32_0 = arith.constant 0 : i32
    %c0_i32_1 = arith.constant 0 : i32
    return %c0_i32, %c0_i32_0 : i32, i32
  }
  func.func @transform_6(%arg0: i32, %arg1: i32) -> (i32, i32) {
    %c0_i32 = arith.constant 0 : i32
    %c0_i32_0 = arith.constant 0 : i32
    %c0_i32_1 = arith.constant 0 : i32
    return %c0_i32, %c0_i32_0 : i32, i32
  }
  func.func @transform_7(%arg0: i32, %arg1: i32) -> (i32, i32) {
    %c0_i32 = arith.constant 0 : i32
    %c0_i32_0 = arith.constant 0 : i32
    %c0_i32_1 = arith.constant 0 : i32
    return %c0_i32, %c0_i32_0 : i32, i32
  }
  func.func @transform_8(%arg0: i32, %arg1: i32) -> (i32, i32) {
    %c0_i32 = arith.constant 0 : i32
    %c0_i32_0 = arith.constant 0 : i32
    %c0_i32_1 = arith.constant 0 : i32
    return %c0_i32, %c0_i32_0 : i32, i32
  }
  func.func @transform_9(%arg0: i32, %arg1: i32) -> (i32, i32) {
    %c0_i32 = arith.constant 0 : i32
    %c0_i32_0 = arith.constant 0 : i32
    return %arg0, %c0_i32 : i32, i32
  }
}

</mosaic_0001>

<bundles_post_ra>
// kernel: relation_classifier_forward.1
= control target key start
LH: loop header
LB: loop body
LE: loop exit
PB: predicated region body
PF: predicated region fallthrough
CT: control target
= control target key end

     0   :  { %vm537_vm0 = vcmask 261120   ;;  %s1055_s1 = inlined_call_operand.vmem [shape: bf16[128,256], index: 1, kind: input, shape index: {}]   ;;  %s1056_s3 = inlined_call_operand.vmem [shape: bf16[256,128], index: 3, kind: input, shape index: {}]   ;;  %s1057_s0 = inlined_call_operand.vmem [shape: bf16[16,128], index: 0, kind: input, shape index: {}]   ;;  %s1058_s4 = inlined_call_operand.vmem [shape: f32[1,128], index: 4, kind: input, shape index: {}]   ;;  %s1059_s5 = inlined_call_operand.vmem [shape: bf16[128,128], index: 5, kind: input, shape index: {}]   ;;  %s1060_s2 = inlined_call_operand.vmem [shape: f32[1,256], index: 2, kind: input, shape index: {}]   ;;  %s1061_s6 = inlined_call_operand.vmem [shape: f32[1,128], index: 6, kind: input, shape index: {}]   ;;  %s1062_s7 = inlined_call_operand.vmem [shape: bf16[128,32], index: 7, kind: input, shape index: {}]   ;;  %s1063_s8 = inlined_call_operand.vmem [shape: f32[1,32], index: 8, kind: input, shape index: {}]   ;;  %s1064_s9 = inlined_call_operand.vmem [shape: f32[16,32], index: 9, kind: output, shape index: {}]  }
   0x1   :  { %v606_v0 = vld [vmem:[%s1055_s1 + $0x70] sm:$0xf]  ;;  %v756_v1 = vld [vmem:[%s1055_s1 + $0x74] sm:$0xf0]  ;;  %v755_v2 = vld [vmem:[%s1055_s1 + $0x74] sm:$0xf] }
   0x2   :  { %v607_v3 = vor.u32 %v756_v1, %v606_v0  ;;  %v608_v4 = vld [vmem:[%s1055_s1 + $0x78] sm:$0xf0]  ;;  %v598_v5 = vld [vmem:[%s1055_s1 + $0x60] sm:$0xf]  ;;  %v754_v6 = vld [vmem:[%s1055_s1 + $0x64] sm:$0xf0] }
   0x3   :  { %v611_v7 = vor.u32 %v755_v2, %v608_v4  ;;  %v753_v8 = vld [vmem:[%s1055_s1 + $0x64] sm:$0xf]  ;;  %v600_v9 = vld [vmem:[%s1055_s1 + $0x68] sm:$0xf0]  ;;  %v599_v10 = vor.u32 %v754_v6, %v598_v5  ;;  %v590_v12 = vld [vmem:[%s1055_s1 + $0x50] sm:$0xf] }
   0x4   :  { %148 = vmatpush.bf16.msra.mxu0 %v607_v3  ;;  %v603_v11 = vor.u32 %v753_v8, %v600_v9  ;;  %v752_v13 = vld [vmem:[%s1055_s1 + $0x54] sm:$0xf0]  ;;  %v751_v14 = vld [vmem:[%s1055_s1 + $0x54] sm:$0xf]  ;;  %v592_v15 = vld [vmem:[%s1055_s1 + $0x58] sm:$0xf0] }
   0x5   :  { %162 = vmatpush.bf16.msra.mxu1 %v611_v7  ;;  %v591_v16 = vor.u32 %v752_v13, %v590_v12  ;;  %v595_v17 = vor.u32 %v751_v14, %v592_v15  ;;  %v582_v18 = vld [vmem:[%s1055_s1 + $0x40] sm:$0xf]  ;;  %v750_v19 = vld [vmem:[%s1055_s1 + $0x44] sm:$0xf0]  ;;  %v749_v20 = vld [vmem:[%s1055_s1 + $0x44] sm:$0xf] }
   0x6   :  { %v584_v21 = vld [vmem:[%s1055_s1 + $0x48] sm:$0xf0]  ;;  %v583_v22 = vor.u32 %v750_v19, %v582_v18  ;;  %v764_v23 = vld [vmem:[%s1056_s3 + $0x38] sm:$0xff]  ;;  %v574_v26 = vld [vmem:[%s1055_s1 + $0x30] sm:$0xf] }
   0x7   :  { %v772_v24 = vld [vmem:[%s1056_s3 + $0x78] sm:$0xff]  ;;  %v587_v25 = vor.u32 %v749_v20, %v584_v21  ;;  %v747_v28 = vld [vmem:[%s1055_s1 + $0x34] sm:$0xf]  ;;  %339 = vmatpush.bf16.msra.mxu2 %v764_v23  ;;  %v566_v34 = vld [vmem:[%s1055_s1 + $0x20] sm:$0xf] }
   0x8   :  { %149 = vmatpush.bf16.msra.mxu0 %v599_v10  ;;  %v748_v27 = vld [vmem:[%s1055_s1 + $0x34] sm:$0xf0]  ;;  %v576_v29 = vld [vmem:[%s1055_s1 + $0x38] sm:$0xf0]  ;;  %353 = vmatpush.bf16.msra.mxu3 %v772_v24  ;;  %v763_v30 = vld [vmem:[%s1056_s3 + $0x30] sm:$0xff] }
   0x9   :  { %163 = vmatpush.bf16.msra.mxu1 %v603_v11  ;;  %v771_v31 = vld [vmem:[%s1056_s3 + $0x70] sm:$0xff]  ;;  %v575_v32 = vor.u32 %v748_v27, %v574_v26  ;;  %v579_v33 = vor.u32 %v747_v28, %v576_v29  ;;  %v746_v35 = vld [vmem:[%s1055_s1 + $0x24] sm:$0xf0]  ;;  %v745_v36 = vld [vmem:[%s1055_s1 + $0x24] sm:$0xf] }
   0xa   :  { %v568_v37 = vld [vmem:[%s1055_s1 + $0x28] sm:$0xf0]  ;;  %v567_v40 = vor.u32 %v746_v35, %v566_v34  ;;  %v558_v42 = vld [vmem:[%s1055_s1 + $0x10] sm:$0xf]  ;;  %v744_v43 = vld [vmem:[%s1055_s1 + $0x14] sm:$0xf0] }
   0xb   :  { %340 = vmatpush.bf16.msra.mxu2 %v763_v30  ;;  %v762_v38 = vld [vmem:[%s1056_s3 + $0x28] sm:$0xff]  ;;  %v571_v41 = vor.u32 %v745_v36, %v568_v37  ;;  %v743_v44 = vld [vmem:[%s1055_s1 + $0x14] sm:$0xf]  ;;  %v560_v45 = vld [vmem:[%s1055_s1 + $0x18] sm:$0xf0]  ;;  %v559_v48 = vor.u32 %v744_v43, %v558_v42 }
   0xc   :  { %150 = vmatpush.bf16.msra.mxu0 %v591_v16  ;;  %354 = vmatpush.bf16.msra.mxu3 %v771_v31  ;;  %v770_v39 = vld [vmem:[%s1056_s3 + $0x68] sm:$0xff]  ;;  %v761_v46 = vld [vmem:[%s1056_s3 + $0x20] sm:$0xff]  ;;  %v563_v49 = vor.u32 %v743_v44, %v560_v45  ;;  %v760_v57 = vld [vmem:[%s1056_s3 + $0x18] sm:$0xff] }
   0xd   :  { %164 = vmatpush.bf16.msra.mxu1 %v595_v17  ;;  %v769_v47 = vld [vmem:[%s1056_s3 + $0x60] sm:$0xff]  ;;  %v742_v51 = vld [vmem:[%s1055_s1 + $0x4] sm:$0xf0]  ;;  %v552_v53 = vld [vmem:[%s1055_s1 + $0x8] sm:$0xf0] }
   0xe   :  { %v550_v50 = vld [vmem:[%s1055_s1] sm:$0xf]  ;;  %v741_v52 = vld [vmem:[%s1055_s1 + $0x4] sm:$0xf]  ;;  %v768_v58 = vld [vmem:[%s1056_s3 + $0x58] sm:$0xff] }
   0xf   :  { %341 = vmatpush.bf16.msra.mxu2 %v762_v38  ;;  %v551_v54 = vor.u32 %v742_v51, %v550_v50  ;;  %v555_v55 = vor.u32 %v741_v52, %v552_v53  ;;  %v740_v56 = vld [vmem:[%s1057_s0] sm:$0xff]  ;;  %v759_v59 = vld [vmem:[%s1056_s3 + $0x10] sm:$0xff]  ;;  %v758_v61 = vld [vmem:[%s1056_s3 + $0x8] sm:$0xff] }
  0x10   :  { %151 = vmatpush.bf16.msra.mxu0 %v583_v22  ;;  %355 = vmatpush.bf16.msra.mxu3 %v770_v39  ;;  %v767_v60 = vld [vmem:[%s1056_s3 + $0x50] sm:$0xff]  ;;  %v766_v62 = vld [vmem:[%s1056_s3 + $0x48] sm:$0xff]  ;;  %v757_v63 = vld [vmem:[%s1056_s3] sm:$0xff] }
  0x11   :  { %165 = vmatpush.bf16.msra.mxu1 %v587_v25  ;;  %v765_v0 = vld [vmem:[%s1056_s3 + $0x40] sm:$0xff]  ;;  %v780_v1 = vld [vmem:[%s1059_s5 + $0x38] sm:$0xff]  ;;  %v779_v2 = vld [vmem:[%s1059_s5 + $0x30] sm:$0xff] }
  0x12   :  { %v778_v3 = vld [vmem:[%s1059_s5 + $0x28] sm:$0xff]  ;;  %v777_v4 = vld [vmem:[%s1059_s5 + $0x20] sm:$0xff]  ;;  %v776_v22 = vld [vmem:[%s1059_s5 + $0x18] sm:$0xff] }
  0x13   :  { %342 = vmatpush.bf16.msra.mxu2 %v761_v46  ;;  %v191_v6 = vld [vmem:[%s1060_s2] sm:$0x3]  ;;  %v775_v23 = vld [vmem:[%s1059_s5 + $0x10] sm:$0xff]  ;;  %v774_v24 = vld [vmem:[%s1059_s5 + $0x8] sm:$0xff] }
  0x14   :  { %152 = vmatpush.bf16.msra.mxu0 %v575_v32  ;;  %356 = vmatpush.bf16.msra.mxu3 %v769_v47  ;;  %v193_v8 = vperm.slane %v191_v6, 0  ;;  %v194_v9 = vperm.slane %v191_v6, 1  ;;  %v773_v25 = vld [vmem:[%s1059_s5] sm:$0xff]  ;;  %v788_v26 = vld [vmem:[%s1062_s7 + $0x38] sm:$0xff]  ;;  %v787_v27 = vld [vmem:[%s1062_s7 + $0x30] sm:$0xff] }
  0x15   :  { %166 = vmatpush.bf16.msra.mxu1 %v579_v33  ;;  %v786_v28 = vld [vmem:[%s1062_s7 + $0x28] sm:$0xff]  ;;  %v785_v29 = vld [vmem:[%s1062_s7 + $0x20] sm:$0xff]  ;;  %v784_v42 = vld [vmem:[%s1062_s7 + $0x18] sm:$0xff] }
  0x16   :  { %v789_v31 = vld [vmem:[%s1058_s4] ss:$0 sm:$0xff]  ;;  %v783_v43 = vld [vmem:[%s1062_s7 + $0x10] sm:$0xff]  ;;  %v782_v44 = vld [vmem:[%s1062_s7 + $0x8] sm:$0xff] }
  0x17   :  { %343 = vmatpush.bf16.msra.mxu2 %v760_v57  ;;  %v781_v45 = vld [vmem:[%s1062_s7] sm:$0xff] }
  0x18   :  { %153 = vmatpush.bf16.msra.mxu0 %v567_v40  ;;  %357 = vmatpush.bf16.msra.mxu3 %v768_v58  ;;  %v790_v47 = vld [vmem:[%s1061_s6] ss:$0 sm:$0xff] }
  0x19   :  { %167 = vmatpush.bf16.msra.mxu1 %v571_v41 }
  0x1b   :  { %344 = vmatpush.bf16.msra.mxu2 %v759_v59 }
  0x1c   :  { %154 = vmatpush.bf16.msra.mxu0 %v559_v48  ;;  %358 = vmatpush.bf16.msra.mxu3 %v767_v60 }
  0x1d   :  { %168 = vmatpush.bf16.msra.mxu1 %v563_v49 }
  0x1f   :  { %345 = vmatpush.bf16.msra.mxu2 %v758_v61 }
  0x20   :  { %155 = vmatpush.bf16.msra.mxu0 %v551_v54  ;;  %359 = vmatpush.bf16.msra.mxu3 %v766_v62  ;;  %v791_v54 = vld [vmem:[%s1063_s8] ss:$0 sm:$0xff] }
  0x21   :  { %169 = vmatpush.bf16.msra.mxu1 %v555_v55 }
  0x23   :  { %156 = vmatmul.bf16.vlgmr.msra.gmra.mxu0 %v740_v56  ;;  %346 = vmatpush.bf16.msra.mxu2 %v757_v63 }
  0x24   :  { %170 = vmatmul.bf16.vlgmr.msra.gmra.mxu1 %v740_v56  ;;  %360 = vmatpush.bf16.msra.mxu3 %v765_v0 }
  0x25   :  { %438 = vmatpush.bf16.msrb.mxu0 %v780_v1  ;;  %523 = vmatpush.bf16.msrb.mxu1 %v788_v26 }
  0x29   :  { %439 = vmatpush.bf16.msrb.mxu0 %v779_v2  ;;  %524 = vmatpush.bf16.msrb.mxu1 %v787_v27 }
  0x2d   :  { %440 = vmatpush.bf16.msrb.mxu0 %v778_v3  ;;  %525 = vmatpush.bf16.msrb.mxu1 %v786_v28 }
  0x31   :  { %441 = vmatpush.bf16.msrb.mxu0 %v777_v4  ;;  %526 = vmatpush.bf16.msrb.mxu1 %v785_v29 }
  0x35   :  { %442 = vmatpush.bf16.msrb.mxu0 %v776_v22  ;;  %527 = vmatpush.bf16.msrb.mxu1 %v784_v42 }
  0x39   :  { %443 = vmatpush.bf16.msrb.mxu0 %v775_v23  ;;  %528 = vmatpush.bf16.msrb.mxu1 %v783_v43 }
  0x3d   :  { %444 = vmatpush.bf16.msrb.mxu0 %v774_v24  ;;  %529 = vmatpush.bf16.msrb.mxu1 %v782_v44 }
  0x41   :  { %445 = vmatpush.bf16.msrb.mxu0 %v773_v25  ;;  %530 = vmatpush.bf16.msrb.mxu1 %v781_v45 }
  0xa0   :  { %v157_v5 = vpop.f32.mrf.mxu0 }
  0xa1   :  { %v171_v7 = vpop.f32.mrf.mxu1  ;;  %v197_v10 = vadd.f32 %v193_v8, %v157_v5 }
  0xa2   :  { %v198_v11 = vadd.f32 %v194_v9, %v171_v7 }
  0xa3   :  { %v201_v16 = vmax.f32 %v197_v10, 0.0 }
  0xa4   :  { %v202_v18 = vmax.f32 %v198_v11, 0.0 }
  0xa8   :  { %v159_v12 = vpop.f32.mrf.mxu0 }
  0xa9   :  { %v199_v13 = vadd.f32 %v193_v8, %v159_v12  ;;  %v173_v14 = vpop.f32.mrf.mxu1 }
  0xaa   :  { %v200_v15 = vadd.f32 %v194_v9, %v173_v14 }
  0xab   :  { %v203_v17 = vmax.f32 %v199_v13, 0.0 }
  0xac   :  { %v204_v19 = vmax.f32 %v200_v15, 0.0 }
  0xad   :  { %v205_v20 = vpack.c.bf16 %v203_v17, %v201_v16 }
  0xae   :  { %v206_v21 = vpack.c.bf16 %v204_v19, %v202_v18 }
  0xaf   :  { %347 = vmatmul.bf16.vlgmr.msra.gmra.mxu2 %v205_v20 }
  0xb0   :  { %361 = vmatmul.bf16.vlgmr.msra.gmra.mxu3 %v206_v21 }
 0x132   :  { %v348_v30 = vpop.f32.mrf.mxu2 }
 0x133   :  { %v362_v32 = vpop.f32.mrf.mxu3  ;;  %v349_v33 = vadd.f32 %v789_v31, %v348_v30 }
 0x135   :  { %v363_v35 = vadd.f32 %v362_v32, %v349_v33 }
 0x137   :  { %v367_v39 = vmax.f32 %v363_v35, 0.0 }
 0x13a   :  { %v350_v34 = vpop.f32.mrf.mxu2 }
 0x13b   :  { %v351_v36 = vadd.f32 %v789_v31, %v350_v34  ;;  %v364_v37 = vpop.f32.mrf.mxu3 }
 0x13d   :  { %v365_v38 = vadd.f32 %v364_v37, %v351_v36 }
 0x13f   :  { %v368_v40 = vmax.f32 %v365_v38, 0.0 }
 0x141   :  { %v369_v41 = vpack.c.bf16 %v368_v40, %v367_v39 }
 0x143   :  { %446 = vmatmul.bf16.vlgmr.msrb.gmra.mxu0 %v369_v41 }
 0x1c0   :  { %v447_v46 = vpop.f32.mrf.mxu0 }
 0x1c1   :  { %v448_v48 = vadd.f32 %v790_v47, %v447_v46 }
 0x1c3   :  { %v452_v51 = vmax.f32 %v448_v48, 0.0 }
 0x1c8   :  { %v449_v49 = vpop.f32.mrf.mxu0 }
 0x1c9   :  { %v450_v50 = vadd.f32 %v790_v47, %v449_v49 }
 0x1cb   :  { %v453_v52 = vmax.f32 %v450_v50, 0.0 }
 0x1cd   :  { %v454_v53 = vpack.c.bf16 %v453_v52, %v452_v51 }
 0x1cf   :  { %531 = vmatmul.bf16.vlgmr.msrb.gmra.mxu1 %v454_v53 }
 0x24c   :  { %v532_v55 = vpop.f32.mrf.mxu1 }
 0x24d   :  { %v533_v56 = vadd.f32 %v791_v54, %v532_v55 }
 0x24f   :  { %538 = vst.msk [vmem:[%s1064_s9] sm:$0xff] %vm537_vm0, %v533_v56 }
 0x254   :  { %v534_v57 = vpop.f32.mrf.mxu1 }
 0x255   :  { %v535_v58 = vadd.f32 %v791_v54, %v534_v57 }
 0x257   :  { %539 = vst.msk [vmem:[%s1064_s9 + $0x8] sm:$0xff] %vm537_vm0, %v535_v58 }

// kernel: relation_classifier_forward.1
= control target key start
LH: loop header
LB: loop body
LE: loop exit
PB: predicated region body
PF: predicated region fallthrough
CT: control target
= control target key end

     0   :  { %vm537_vm0 = vcmask 261120   ;;  %s1055_s1 = inlined_call_operand.vmem [shape: bf16[128,256], index: 1, kind: input, shape index: {}]   ;;  %s1056_s3 = inlined_call_operand.vmem [shape: bf16[256,128], index: 3, kind: input, shape index: {}]   ;;  %s1057_s0 = inlined_call_operand.vmem [shape: bf16[16,128], index: 0, kind: input, shape index: {}]   ;;  %s1058_s4 = inlined_call_operand.vmem [shape: f32[1,128], index: 4, kind: input, shape index: {}]   ;;  %s1059_s5 = inlined_call_operand.vmem [shape: bf16[128,128], index: 5, kind: input, shape index: {}]   ;;  %s1060_s2 = inlined_call_operand.vmem [shape: f32[1,256], index: 2, kind: input, shape index: {}]   ;;  %s1061_s6 = inlined_call_operand.vmem [shape: f32[1,128], index: 6, kind: input, shape index: {}]   ;;  %s1062_s7 = inlined_call_operand.vmem [shape: bf16[128,32], index: 7, kind: input, shape index: {}]   ;;  %s1063_s8 = inlined_call_operand.vmem [shape: f32[1,32], index: 8, kind: input, shape index: {}]   ;;  %s1064_s9 = inlined_call_operand.vmem [shape: f32[16,32], index: 9, kind: output, shape index: {}]  }
   0x1   :  { %v606_v0 = vld [vmem:[%s1055_s1 + $0x70] sm:$0xf]  ;;  %v756_v1 = vld [vmem:[%s1055_s1 + $0x74] sm:$0xf0]  ;;  %v755_v2 = vld [vmem:[%s1055_s1 + $0x74] sm:$0xf] }
   0x2   :  { %v607_v3 = vor.u32 %v756_v1, %v606_v0  ;;  %v608_v4 = vld [vmem:[%s1055_s1 + $0x78] sm:$0xf0]  ;;  %v598_v5 = vld [vmem:[%s1055_s1 + $0x60] sm:$0xf]  ;;  %v754_v6 = vld [vmem:[%s1055_s1 + $0x64] sm:$0xf0] }
   0x3   :  { %v611_v7 = vor.u32 %v755_v2, %v608_v4  ;;  %v753_v8 = vld [vmem:[%s1055_s1 + $0x64] sm:$0xf]  ;;  %v600_v9 = vld [vmem:[%s1055_s1 + $0x68] sm:$0xf0]  ;;  %v599_v10 = vor.u32 %v754_v6, %v598_v5  ;;  %v590_v12 = vld [vmem:[%s1055_s1 + $0x50] sm:$0xf] }
   0x4   :  { %148 = vmatpush.bf16.msra.mxu0 %v607_v3  ;;  %v603_v11 = vor.u32 %v753_v8, %v600_v9  ;;  %v752_v13 = vld [vmem:[%s1055_s1 + $0x54] sm:$0xf0]  ;;  %v751_v14 = vld [vmem:[%s1055_s1 + $0x54] sm:$0xf]  ;;  %v592_v15 = vld [vmem:[%s1055_s1 + $0x58] sm:$0xf0] }
   0x5   :  { %162 = vmatpush.bf16.msra.mxu1 %v611_v7  ;;  %v591_v16 = vor.u32 %v752_v13, %v590_v12  ;;  %v595_v17 = vor.u32 %v751_v14, %v592_v15  ;;  %v582_v18 = vld [vmem:[%s1055_s1 + $0x40] sm:$0xf]  ;;  %v750_v19 = vld [vmem:[%s1055_s1 + $0x44] sm:$0xf0]  ;;  %v749_v20 = vld [vmem:[%s1055_s1 + $0x44] sm:$0xf] }
   0x6   :  { %v584_v21 = vld [vmem:[%s1055_s1 + $0x48] sm:$0xf0]  ;;  %v583_v22 = vor.u32 %v750_v19, %v582_v18  ;;  %v764_v23 = vld [vmem:[%s1056_s3 + $0x38] sm:$0xff]  ;;  %v574_v26 = vld [vmem:[%s1055_s1 + $0x30] sm:$0xf] }
   0x7   :  { %v772_v24 = vld [vmem:[%s1056_s3 + $0x78] sm:$0xff]  ;;  %v587_v25 = vor.u32 %v749_v20, %v584_v21  ;;  %v747_v28 = vld [vmem:[%s1055_s1 + $0x34] sm:$0xf]  ;;  %339 = vmatpush.bf16.msra.mxu2 %v764_v23  ;;  %v566_v34 = vld [vmem:[%s1055_s1 + $0x20] sm:$0xf] }
   0x8   :  { %149 = vmatpush.bf16.msra.mxu0 %v599_v10  ;;  %v748_v27 = vld [vmem:[%s1055_s1 + $0x34] sm:$0xf0]  ;;  %v576_v29 = vld [vmem:[%s1055_s1 + $0x38] sm:$0xf0]  ;;  %353 = vmatpush.bf16.msra.mxu3 %v772_v24  ;;  %v763_v30 = vld [vmem:[%s1056_s3 + $0x30] sm:$0xff] }
   0x9   :  { %163 = vmatpush.bf16.msra.mxu1 %v603_v11  ;;  %v771_v31 = vld [vmem:[%s1056_s3 + $0x70] sm:$0xff]  ;;  %v575_v32 = vor.u32 %v748_v27, %v574_v26  ;;  %v579_v33 = vor.u32 %v747_v28, %v576_v29  ;;  %v746_v35 = vld [vmem:[%s1055_s1 + $0x24] sm:$0xf0]  ;;  %v745_v36 = vld [vmem:[%s1055_s1 + $0x24] sm:$0xf] }
   0xa   :  { %v568_v37 = vld [vmem:[%s1055_s1 + $0x28] sm:$0xf0]  ;;  %v567_v40 = vor.u32 %v746_v35, %v566_v34  ;;  %v558_v42 = vld [vmem:[%s1055_s1 + $0x10] sm:$0xf]  ;;  %v744_v43 = vld [vmem:[%s1055_s1 + $0x14] sm:$0xf0] }
   0xb   :  { %340 = vmatpush.bf16.msra.mxu2 %v763_v30  ;;  %v762_v38 = vld [vmem:[%s1056_s3 + $0x28] sm:$0xff]  ;;  %v571_v41 = vor.u32 %v745_v36, %v568_v37  ;;  %v743_v44 = vld [vmem:[%s1055_s1 + $0x14] sm:$0xf]  ;;  %v560_v45 = vld [vmem:[%s1055_s1 + $0x18] sm:$0xf0]  ;;  %v559_v48 = vor.u32 %v744_v43, %v558_v42 }
   0xc   :  { %150 = vmatpush.bf16.msra.mxu0 %v591_v16  ;;  %354 = vmatpush.bf16.msra.mxu3 %v771_v31  ;;  %v770_v39 = vld [vmem:[%s1056_s3 + $0x68] sm:$0xff]  ;;  %v761_v46 = vld [vmem:[%s1056_s3 + $0x20] sm:$0xff]  ;;  %v563_v49 = vor.u32 %v743_v44, %v560_v45  ;;  %v760_v57 = vld [vmem:[%s1056_s3 + $0x18] sm:$0xff] }
   0xd   :  { %164 = vmatpush.bf16.msra.mxu1 %v595_v17  ;;  %v769_v47 = vld [vmem:[%s1056_s3 + $0x60] sm:$0xff]  ;;  %v742_v51 = vld [vmem:[%s1055_s1 + $0x4] sm:$0xf0]  ;;  %v552_v53 = vld [vmem:[%s1055_s1 + $0x8] sm:$0xf0] }
   0xe   :  { %v550_v50 = vld [vmem:[%s1055_s1] sm:$0xf]  ;;  %v741_v52 = vld [vmem:[%s1055_s1 + $0x4] sm:$0xf]  ;;  %v768_v58 = vld [vmem:[%s1056_s3 + $0x58] sm:$0xff] }
   0xf   :  { %341 = vmatpush.bf16.msra.mxu2 %v762_v38  ;;  %v551_v54 = vor.u32 %v742_v51, %v550_v50  ;;  %v555_v55 = vor.u32 %v741_v52, %v552_v53  ;;  %v740_v56 = vld [vmem:[%s1057_s0] sm:$0xff]  ;;  %v759_v59 = vld [vmem:[%s1056_s3 + $0x10] sm:$0xff]  ;;  %v758_v61 = vld [vmem:[%s1056_s3 + $0x8] sm:$0xff] }
  0x10   :  { %151 = vmatpush.bf16.msra.mxu0 %v583_v22  ;;  %355 = vmatpush.bf16.msra.mxu3 %v770_v39  ;;  %v767_v60 = vld [vmem:[%s1056_s3 + $0x50] sm:$0xff]  ;;  %v766_v62 = vld [vmem:[%s1056_s3 + $0x48] sm:$0xff]  ;;  %v757_v63 = vld [vmem:[%s1056_s3] sm:$0xff] }
  0x11   :  { %165 = vmatpush.bf16.msra.mxu1 %v587_v25  ;;  %v765_v0 = vld [vmem:[%s1056_s3 + $0x40] sm:$0xff]  ;;  %v780_v1 = vld [vmem:[%s1059_s5 + $0x38] sm:$0xff]  ;;  %v779_v2 = vld [vmem:[%s1059_s5 + $0x30] sm:$0xff] }
  0x12   :  { %v778_v3 = vld [vmem:[%s1059_s5 + $0x28] sm:$0xff]  ;;  %v777_v4 = vld [vmem:[%s1059_s5 + $0x20] sm:$0xff]  ;;  %v776_v22 = vld [vmem:[%s1059_s5 + $0x18] sm:$0xff] }
  0x13   :  { %342 = vmatpush.bf16.msra.mxu2 %v761_v46  ;;  %v191_v6 = vld [vmem:[%s1060_s2] sm:$0x3]  ;;  %v775_v23 = vld [vmem:[%s1059_s5 + $0x10] sm:$0xff]  ;;  %v774_v24 = vld [vmem:[%s1059_s5 + $0x8] sm:$0xff] }
  0x14   :  { %152 = vmatpush.bf16.msra.mxu0 %v575_v32  ;;  %356 = vmatpush.bf16.msra.mxu3 %v769_v47  ;;  %v193_v8 = vperm.slane %v191_v6, 0  ;;  %v194_v9 = vperm.slane %v191_v6, 1  ;;  %v773_v25 = vld [vmem:[%s1059_s5] sm:$0xff]  ;;  %v788_v26 = vld [vmem:[%s1062_s7 + $0x38] sm:$0xff]  ;;  %v787_v27 = vld [vmem:[%s1062_s7 + $0x30] sm:$0xff] }
  0x15   :  { %166 = vmatpush.bf16.msra.mxu1 %v579_v33  ;;  %v786_v28 = vld [vmem:[%s1062_s7 + $0x28] sm:$0xff]  ;;  %v785_v29 = vld [vmem:[%s1062_s7 + $0x20] sm:$0xff]  ;;  %v784_v42 = vld [vmem:[%s1062_s7 + $0x18] sm:$0xff] }
  0x16   :  { %v789_v31 = vld [vmem:[%s1058_s4] ss:$0 sm:$0xff]  ;;  %v783_v43 = vld [vmem:[%s1062_s7 + $0x10] sm:$0xff]  ;;  %v782_v44 = vld [vmem:[%s1062_s7 + $0x8] sm:$0xff] }
  0x17   :  { %343 = vmatpush.bf16.msra.mxu2 %v760_v57  ;;  %v781_v45 = vld [vmem:[%s1062_s7] sm:$0xff] }
  0x18   :  { %153 = vmatpush.bf16.msra.mxu0 %v567_v40  ;;  %357 = vmatpush.bf16.msra.mxu3 %v768_v58  ;;  %v790_v47 = vld [vmem:[%s1061_s6] ss:$0 sm:$0xff] }
  0x19   :  { %167 = vmatpush.bf16.msra.mxu1 %v571_v41 }
  0x1b   :  { %344 = vmatpush.bf16.msra.mxu2 %v759_v59 }
  0x1c   :  { %154 = vmatpush.bf16.msra.mxu0 %v559_v48  ;;  %358 = vmatpush.bf16.msra.mxu3 %v767_v60 }
  0x1d   :  { %168 = vmatpush.bf16.msra.mxu1 %v563_v49 }
  0x1f   :  { %345 = vmatpush.bf16.msra.mxu2 %v758_v61 }
  0x20   :  { %155 = vmatpush.bf16.msra.mxu0 %v551_v54  ;;  %359 = vmatpush.bf16.msra.mxu3 %v766_v62  ;;  %v791_v54 = vld [vmem:[%s1063_s8] ss:$0 sm:$0xff] }
  0x21   :  { %169 = vmatpush.bf16.msra.mxu1 %v555_v55 }
  0x23   :  { %156 = vmatmul.bf16.vlgmr.msra.gmra.mxu0 %v740_v56  ;;  %346 = vmatpush.bf16.msra.mxu2 %v757_v63 }
  0x24   :  { %170 = vmatmul.bf16.vlgmr.msra.gmra.mxu1 %v740_v56  ;;  %360 = vmatpush.bf16.msra.mxu3 %v765_v0 }
  0x25   :  { %438 = vmatpush.bf16.msrb.mxu0 %v780_v1  ;;  %523 = vmatpush.bf16.msrb.mxu1 %v788_v26 }
  0x29   :  { %439 = vmatpush.bf16.msrb.mxu0 %v779_v2  ;;  %524 = vmatpush.bf16.msrb.mxu1 %v787_v27 }
  0x2d   :  { %440 = vmatpush.bf16.msrb.mxu0 %v778_v3  ;;  %525 = vmatpush.bf16.msrb.mxu1 %v786_v28 }
  0x31   :  { %441 = vmatpush.bf16.msrb.mxu0 %v777_v4  ;;  %526 = vmatpush.bf16.msrb.mxu1 %v785_v29 }
  0x35   :  { %442 = vmatpush.bf16.msrb.mxu0 %v776_v22  ;;  %527 = vmatpush.bf16.msrb.mxu1 %v784_v42 }
  0x39   :  { %443 = vmatpush.bf16.msrb.mxu0 %v775_v23  ;;  %528 = vmatpush.bf16.msrb.mxu1 %v783_v43 }
  0x3d   :  { %444 = vmatpush.bf16.msrb.mxu0 %v774_v24  ;;  %529 = vmatpush.bf16.msrb.mxu1 %v782_v44 }
  0x41   :  { %445 = vmatpush.bf16.msrb.mxu0 %v773_v25  ;;  %530 = vmatpush.bf16.msrb.mxu1 %v781_v45 }
  0xa0   :  { %v157_v5 = vpop.f32.mrf.mxu0 }
  0xa1   :  { %v171_v7 = vpop.f32.mrf.mxu1  ;;  %v197_v10 = vadd.f32 %v193_v8, %v157_v5 }
  0xa2   :  { %v198_v11 = vadd.f32 %v194_v9, %v171_v7 }
  0xa3   :  { %v201_v16 = vmax.f32 %v197_v10, 0.0 }
  0xa4   :  { %v202_v18 = vmax.f32 %v198_v11, 0.0 }
  0xa8   :  { %v159_v12 = vpop.f32.mrf.mxu0 }
  0xa9   :  { %v199_v13 = vadd.f32 %v193_v8, %v159_v12  ;;  %v173_v14 = vpop.f32.mrf.mxu1 }
  0xaa   :  { %v200_v15 = vadd.f32 %v194_v9, %v173_v14 }
  0xab   :  { %v203_v17 = vmax.f32 %v199_v13, 0.0 }
  0xac   :  { %v204_v19 = vmax.f32 %v200_v15, 0.0 }
  0xad   :  { %v205_v20 = vpack.c.bf16 %v203_v17, %v201_v16 }
  0xae   :  { %v206_v21 = vpack.c.bf16 %v204_v19, %v202_v18 }
  0xaf   :  { %347 = vmatmul.bf16.vlgmr.msra.gmra.mxu2 %v205_v20 }
  0xb0   :  { %361 = vmatmul.bf16.vlgmr.msra.gmra.mxu3 %v206_v21 }
 0x132   :  { %v348_v30 = vpop.f32.mrf.mxu2 }
 0x133   :  { %v362_v32 = vpop.f32.mrf.mxu3  ;;  %v349_v33 = vadd.f32 %v789_v31, %v348_v30 }
 0x135   :  { %v363_v35 = vadd.f32 %v362_v32, %v349_v33 }
 0x137   :  { %v367_v39 = vmax.f32 %v363_v35, 0.0 }
 0x13a   :  { %v350_v34 = vpop.f32.mrf.mxu2 }
 0x13b   :  { %v351_v36 = vadd.f32 %v789_v31, %v350_v34  ;;  %v364_v37 = vpop.f32.mrf.mxu3 }
 0x13d   :  { %v365_v38 = vadd.f32 %v364_v37, %v351_v36 }
 0x13f   :  { %v368_v40 = vmax.f32 %v365_v38, 0.0 }
 0x141   :  { %v369_v41 = vpack.c.bf16 %v368_v40, %v367_v39 }
 0x143   :  { %446 = vmatmul.bf16.vlgmr.msrb.gmra.mxu0 %v369_v41 }
 0x1c0   :  { %v447_v46 = vpop.f32.mrf.mxu0 }
 0x1c1   :  { %v448_v48 = vadd.f32 %v790_v47, %v447_v46 }
 0x1c3   :  { %v452_v51 = vmax.f32 %v448_v48, 0.0 }
 0x1c8   :  { %v449_v49 = vpop.f32.mrf.mxu0 }
 0x1c9   :  { %v450_v50 = vadd.f32 %v790_v47, %v449_v49 }
 0x1cb   :  { %v453_v52 = vmax.f32 %v450_v50, 0.0 }
 0x1cd   :  { %v454_v53 = vpack.c.bf16 %v453_v52, %v452_v51 }
 0x1cf   :  { %531 = vmatmul.bf16.vlgmr.msrb.gmra.mxu1 %v454_v53 }
 0x24c   :  { %v532_v55 = vpop.f32.mrf.mxu1 }
 0x24d   :  { %v533_v56 = vadd.f32 %v791_v54, %v532_v55 }
 0x24f   :  { %538 = vst.msk [vmem:[%s1064_s9] sm:$0xff] %vm537_vm0, %v533_v56 }
 0x254   :  { %v534_v57 = vpop.f32.mrf.mxu1 }
 0x255   :  { %v535_v58 = vadd.f32 %v791_v54, %v534_v57 }
 0x257   :  { %539 = vst.msk [vmem:[%s1064_s9 + $0x8] sm:$0xff] %vm537_vm0, %v535_v58 }

</bundles_post_ra>
